<compile_context>
chip_gen: v7x
topology: tpu7x:2x2x1
jax: 0.10.0
libtpu: 0.0.40
codegen_flags: <defaults>
</compile_context>

<pallas_src>
import jax
import jax.numpy as jnp
from jax import lax
from jax.experimental import pallas as pl
from jax.experimental.pallas import tpu as pltpu


def _round_up(x, m):
    return ((x + m - 1) // m) * m


def _pad2d(a, rows, cols):
    r, c = a.shape
    if r == rows and c == cols:
        return a
    return jnp.zeros((rows, cols), a.dtype).at[:r, :c].set(a)


def _encoder_kernel(x_ref, w_ref, b_ref, o_ref, acc_ref):
    # x_ref:   (tm, tk) bf16  flattened-image tile
    # w_ref:   (tn, tk) bf16  weight tile in torch (hidden, in) layout
    # b_ref:   (1, tn)  f32   bias tile (same block for every grid step)
    # o_ref:   (tm, tn) f32   relu(x @ W^T + b) tile
    # acc_ref: (tm, tn) f32   VMEM accumulator (persists across the K axis)
    k = pl.program_id(2)

    @pl.when(k == 0)
    def _():
        acc_ref[...] = jnp.zeros_like(acc_ref)

    # Contract last dim of both operands -> (tm, tn); consumes the (H, D)
    # torch weight layout directly, no transpose anywhere.
    acc_ref[...] += lax.dot_general(
        x_ref[...], w_ref[...],
        dimension_numbers=(((1,), (1,)), ((), ())),
        preferred_element_type=jnp.float32)

    @pl.when(k == pl.num_programs(2) - 1)
    def _():
        o_ref[...] = jnp.maximum(acc_ref[...] + b_ref[...], 0.0).astype(o_ref.dtype)


def encoder_forward(x_nchw, weight, bias, *, tm=128, tn=256, tk=512):
    """x_nchw: (B, C, H, W) f32; weight: (hidden, C*H*W) f32; bias: (hidden,) f32."""
    B = int(x_nchw.shape[0])
    H, D = int(weight.shape[0]), int(weight.shape[1])

    # Glue: flatten exactly like torch's x.view(x.shape[0], -1) (row-major NCHW).
    x_flat = x_nchw.reshape(B, D)

    # Sublane/lane-aligned padded extents (B -> x8, H -> x128, D -> x128).
    Bp = _round_up(B, 8)
    Hp = _round_up(H, 128)
    Dp = _round_up(D, 128)

    # Clamp tiles to the (padded) problem, then make extents tile-divisible.
    tm = min(tm, Bp)
    tn = min(tn, Hp)
    tk = min(tk, Dp)
    Bp = _round_up(Bp, tm)
    Hp = _round_up(Hp, tn)
    Dp = _round_up(Dp, tk)

    # bf16 matmul operands (f32 accumulation in-kernel).  Zero K-padding
    # contributes nothing to the dot product; padded output rows/cols are
    # sliced off below.
    x_p = _pad2d(x_flat.astype(jnp.bfloat16), Bp, Dp)
    w_p = _pad2d(weight.astype(jnp.bfloat16), Hp, Dp)
    b_p = _pad2d(bias.astype(jnp.float32).reshape(1, H), 1, Hp)

    grid = (Bp // tm, Hp // tn, Dp // tk)

    # Double-buffered input/output tiles + resident accumulator; keep well
    # under the smallest (v7x) scoped-VMEM budget.
    tile_bytes = (2 * (tm * tk * 2 + tn * tk * 2 + tn * 4 + tm * tn * 4)
                  + tm * tn * 4)
    vmem_limit = int(min(max(2 * tile_bytes, 8 * 1024 * 1024), 48 * 1024 * 1024))

    cost = pl.CostEstimate(
        flops=2 * Bp * Dp * Hp,
        transcendentals=0,
        bytes_accessed=(x_p.size * 2 + w_p.size * 2 + b_p.size * 4 + Bp * Hp * 4),
    )

    out_padded = pl.pallas_call(
        _encoder_kernel,
        out_shape=jax.ShapeDtypeStruct((Bp, Hp), jnp.float32),
        grid_spec=pltpu.PrefetchScalarGridSpec(
            num_scalar_prefetch=0,
            grid=grid,
            in_specs=[
                pl.BlockSpec((tm, tk), lambda i, j, k: (i, k)),   # x
                pl.BlockSpec((tn, tk), lambda i, j, k: (j, k)),   # weight (H, D)
                pl.BlockSpec((1, tn), lambda i, j, k: (0, j)),    # bias (resident per-j)
            ],
            out_specs=pl.BlockSpec((tm, tn), lambda i, j, k: (i, j)),
            scratch_shapes=[pltpu.VMEM((tm, tn), jnp.float32)],
        ),
        compiler_params=pltpu.CompilerParams(
            dimension_semantics=("parallel", "parallel", "arbitrary"),
            vmem_limit_bytes=vmem_limit,
        ),
        cost_estimate=cost,
    )(x_p, w_p, b_p)

    return out_padded[:B, :H]


if __name__ == "__main__":
    # Small shapes consistent with the module: image_shape=(4,16,16), hidden=32.
    batch = 2
    image_shape = (4, 16, 16)
    hidden_dim = 32
    D = 4 * 16 * 16

    key = jax.random.PRNGKey(0)
    kx, kw, kb = jax.random.split(key, 3)

    x = jax.random.normal(kx, (batch,) + image_shape, dtype=jnp.float32)
    # Deterministic init mimicking nn.Linear's uniform(-1/sqrt(D), 1/sqrt(D)).
    bound = 1.0 / (D ** 0.5)
    weight = jax.random.uniform(kw, (hidden_dim, D), minval=-bound, maxval=bound,
                                dtype=jnp.float32)
    bias = jax.random.uniform(kb, (hidden_dim,), minval=-bound, maxval=bound,
                              dtype=jnp.float32)

    out = encoder_forward(x, weight, bias)
    out = jax.block_until_ready(out)
    assert out.shape == (batch, hidden_dim)

    # Tight check against a reference using the same bf16 operand cast
    # (kernel accumulates in f32, so these should agree very closely).
    x_bf = x.reshape(batch, -1).astype(jnp.bfloat16).astype(jnp.float32)
    w_bf = weight.astype(jnp.bfloat16).astype(jnp.float32)
    ref_bf16 = jnp.maximum(x_bf @ w_bf.T + bias, 0.0)
    assert jnp.allclose(out, ref_bf16, atol=1e-3, rtol=1e-3)

    # Looser check against the pure-f32 torch-equivalent semantics.
    ref_f32 = jnp.maximum(x.reshape(batch, -1) @ weight.T + bias, 0.0)
    assert jnp.allclose(out, ref_f32, atol=3e-2, rtol=3e-2)

    print("KERNEL_OK")
</pallas_src>

<mosaic_0001>
module attributes {stable_mosaic.version = 11 : i64} {
  func.func @_encoder_kernel(%arg0: i32, %arg1: i32, %arg2: i32, %arg3: memref<8x512xbf16, #tpu.memory_space<vmem>>, %arg4: memref<128x512xbf16, #tpu.memory_space<vmem>>, %arg5: memref<1x128xf32, #tpu.memory_space<vmem>>, %arg6: memref<8x128xf32, #tpu.memory_space<vmem>>, %arg7: memref<8x128xf32, #tpu.memory_space<vmem>>) attributes {dimension_semantics = [#tpu.dimension_semantics<parallel>, #tpu.dimension_semantics<parallel>, #tpu.dimension_semantics<arbitrary>], iteration_bounds = array<i64: 1, 1, 2>, scalar_prefetch = 0 : i64, scratch_operands = 1 : i64, tpu.core_type = #tpu.core_type<tc>, window_params = [{transform_indices = @transform_0, window_bounds = array<i64: 8, 512>}, {transform_indices = @transform_1, window_bounds = array<i64: 128, 512>}, {transform_indices = @transform_2, window_bounds = array<i64: 1, 128>}, {transform_indices = @transform_3, window_bounds = array<i64: 8, 128>}]} {
    %c0_i32 = arith.constant 0 : i32
    %0 = arith.cmpi eq, %arg2, %c0_i32 : i32
    %1 = arith.extui %0 : i1 to i32
    %c0_i32_0 = arith.constant 0 : i32
    %2 = arith.cmpi ne, %1, %c0_i32_0 : i32
    scf.if %2 {
      %cst_9 = arith.constant 0.000000e+00 : f32
      %12 = vector.broadcast %cst_9 : f32 to vector<8x128xf32>
      %c0_10 = arith.constant 0 : index
      %c0_11 = arith.constant 0 : index
      %13 = vector.load %arg7[%c0_10, %c0_11] : memref<8x128xf32, #tpu.memory_space<vmem>>, vector<8x128xf32>
      tpu.vector_store %arg7[%c0_10, %c0_11], %12 {strides = array<i32>} : memref<8x128xf32, #tpu.memory_space<vmem>>, vector<8x128xf32>,
    } else {
    }
    %c0 = arith.constant 0 : index
    %c0_1 = arith.constant 0 : index
    %3 = vector.load %arg7[%c0, %c0_1] : memref<8x128xf32, #tpu.memory_space<vmem>>, vector<8x128xf32>
    %c0_2 = arith.constant 0 : index
    %c0_3 = arith.constant 0 : index
    %4 = vector.load %arg3[%c0_2, %c0_3] : memref<8x512xbf16, #tpu.memory_space<vmem>>, vector<8x512xbf16>
    %c0_4 = arith.constant 0 : index
    %c0_5 = arith.constant 0 : index
    %5 = vector.load %arg4[%c0_4, %c0_5] : memref<128x512xbf16, #tpu.memory_space<vmem>>, vector<128x512xbf16>
    %cst = arith.constant dense<0.000000e+00> : vector<8x128xf32>
    %6 = tpu.matmul %4, %5, %cst {dimension_numbers = #tpu.dot_dimension_numbers<[1], [1], [0], [0], [0, 0, 1, 0], [], []>} : vector<8x512xbf16>, vector<128x512xbf16>, vector<8x128xf32> -> vector<8x128xf32>
    %7 = arith.addf %3, %6 : vector<8x128xf32>
    %c0_6 = arith.constant 0 : index
    %c0_7 = arith.constant 0 : index
    %8 = vector.load %arg7[%c0_6, %c0_7] : memref<8x128xf32, #tpu.memory_space<vmem>>, vector<8x128xf32>
    tpu.vector_store %arg7[%c0_6, %c0_7], %7 {strides = array<i32>} : memref<8x128xf32, #tpu.memory_space<vmem>>, vector<8x128xf32>,
    %c1_i32 = arith.constant 1 : i32
    %9 = arith.cmpi eq, %arg2, %c1_i32 : i32
    %10 = arith.extui %9 : i1 to i32
    %c0_i32_8 = arith.constant 0 : i32
    %11 = arith.cmpi ne, %10, %c0_i32_8 : i32
    scf.if %11 {
      %c0_9 = arith.constant 0 : index
      %c0_10 = arith.constant 0 : index
      %12 = vector.load %arg7[%c0_9, %c0_10] : memref<8x128xf32, #tpu.memory_space<vmem>>, vector<8x128xf32>
      %c0_11 = arith.constant 0 : index
      %c0_12 = arith.constant 0 : index
      %13 = vector.load %arg5[%c0_11, %c0_12] : memref<1x128xf32, #tpu.memory_space<vmem>>, vector<1x128xf32>
      %14 = vector.broadcast %13 : vector<1x128xf32> to vector<8x128xf32>
      %15 = arith.addf %12, %14 : vector<8x128xf32>
      %cst_13 = arith.constant 0.000000e+00 : f32
      %16 = vector.broadcast %cst_13 : f32 to vector<8x128xf32>
      %17 = arith.maximumf %15, %16 : vector<8x128xf32>
      %c0_14 = arith.constant 0 : index
      %c0_15 = arith.constant 0 : index
      %18 = vector.load %arg6[%c0_14, %c0_15] : memref<8x128xf32, #tpu.memory_space<vmem>>, vector<8x128xf32>
      tpu.vector_store %arg6[%c0_14, %c0_15], %17 {strides = array<i32>} : memref<8x128xf32, #tpu.memory_space<vmem>>, vector<8x128xf32>,
    } else {
    }
    return
  }
  func.func @transform_0(%arg0: i32, %arg1: i32, %arg2: i32) -> (i32, i32) {
    %c0_i32 = arith.constant 0 : i32
    return %arg0, %arg2 : i32, i32
  }
  func.func @transform_1(%arg0: i32, %arg1: i32, %arg2: i32) -> (i32, i32) {
    %c0_i32 = arith.constant 0 : i32
    return %arg1, %arg2 : i32, i32
  }
  func.func @transform_2(%arg0: i32, %arg1: i32, %arg2: i32) -> (i32, i32) {
    %c0_i32 = arith.constant 0 : i32
    %c0_i32_0 = arith.constant 0 : i32
    return %c0_i32, %arg1 : i32, i32
  }
  func.func @transform_3(%arg0: i32, %arg1: i32, %arg2: i32) -> (i32, i32) {
    %c0_i32 = arith.constant 0 : i32
    return %arg0, %arg1 : i32, i32
  }
}

</mosaic_0001>

<bundles_post_ra>
// kernel: tpu_custom_call.1
= control target key start
LH: loop header
LB: loop body
LE: loop exit
PB: predicated region body
PF: predicated region fallthrough
CT: control target
= control target key end

     0   :  { %8 = vsyncpa [#allocation4], 0  ;;  %s1292_s0 = inlined_call_operand.hbm [shape: bf16[8,1024], index: 0, kind: input, shape index: {}]   ;;  %s1293_s1 = inlined_call_operand.hbm [shape: bf16[128,1024], index: 1, kind: input, shape index: {}]   ;;  %s1294_s2 = inlined_call_operand.vmem [shape: f32[1,128], index: 2, kind: input, shape index: {}]   ;;  %s1295_s3 = inlined_call_operand.hbm [shape: f32[8,128], index: 3, kind: output, shape index: {}]  }
   0x1   :  { %10 = vsyncpa [#allocation4 + $0x1], 0 }
   0x2   :  { %11 = vsyncpa [#allocation7], 0 }
   0x3   :  { %13 = vsyncpa [#allocation7 + $0x1], 0 }
   0x4   :  { %14 = vsyncpa [#allocation5], 0  ;;  %s1049_s12 = smov 0   ;;  %s1051_s13 = smov 0  }
   0x5   :  { %s1053_s14 = smov 0   ;;  %s1055_s15 = smov 0  }
   0x6   :  { %s1057_s16 = smov 0   ;;  %s1059_s17 = smov 0  }
   0x7 LB: > { %s695_s18 = sadd.s32 4294967295, %s1020_s17   ;;  %s32_s19 = sadd.s32 1, %s1016_s16  ;;  %s1020_s17 = sphi %s1059_s17, %s20_s17   ;;  %s1016_s16 = sphi %s1057_s16, %s1307_s16   ;;  %s1012_s15 = sphi %s1055_s15, %s1306_s15   ;;  %s1008_s14 = sphi %s1053_s14, %s1305_s14   ;;  %s1004_s13 = sphi %s1051_s13, %s1304_s13   ;;  %s1000_s12 = sphi %s1049_s12, %s1303_s12  }
   0x8   : > { %p33_p0 = scmp.ge.s32.totalorder %s32_s19, 2  ;;  %s48_s20 = sadd.s32 1, %s1008_s14 }
   0x9   : > { %p55_p1 = scmp.ne.s32.totalorder %s1008_s14, %s1004_s13  ;;  %p56_p2 = scmp.eq.s32.totalorder %s1020_s17, 0 }
   0xa   : > { %s1309_s19 = smov (%p33_p0, %s32_s19), 0  ;;  %p61_p4 = scmp.ne.s32.totalorder %s1004_s13, %s1000_s12 }
   0xb   : > { %p1085_p3 = por %p56_p2, %p55_p1  ;;  %s44_s22 = ssub.s32 %s1016_s16, %s1309_s19 }
   0xc   : > { %p62_p5 = scmp.eq.s32.totalorder %s695_s18, 0  ;;  %p46_p6 = scmp.eq.s32.totalorder %s44_s22, 0 }
   0xd   : > { %p768_p8 = scmp.lt.s32.totalorder %s1020_s17, 2  ;;  %s1103_s25 = sand.u32 1, %s1008_s14  }
   0xe   : > { %p1094_p7 = por %p62_p5, %p61_p4  ;;  %s751_s26 = sshll.u32 %s1016_s16, 8 }
   0xf   : > { %s1100_s24 = scalar_select %p46_p6, %s1008_s14, %s48_s20  }
  0x10   : > { %s1298_s23 = scalar_select %p1094_p7, 1, 0 }
  0x11   : > { %s699_s27 = sshll.u32 %s1103_s25, 4  ;;  %s1112_s30 = scalar_lea.hbm %s1292_s0, %s751_s26 }
  0x12   : > { %s177_s4 = scalar_lea.vmem [#allocation3], %s699_s27  ;;  %p1116_p9 = pnand %p768_p8, %p1085_p3 }
  0x13   : > { %s187_s5 = sshll.u32 %s177_s4, 4  ;;  %s702_s7 = sshll.u32 %s1103_s25, 8  ;;  %s1120_s5 = int_to_ptr.vmem [resolvable:$true] %s187_s5 }
  0x14   : > { %s174_s8 = scalar_lea.sflag [#allocation4], %s1103_s25  ;;  %s876_s9 = scalar_lea.hbm %s1112_s30, 256 }
  0x15   : > { %p877_p10 = scmp.ne.s32.totalorder %s1112_s30, %s876_s9  ;;  %p878_p11 = pneg %p1116_p9 }
  0x16   : > { %s881_s12 = scalar_lea.hbm %s1292_s0, 512  ;;  %p882_p0 = scmp.lt.u32.totalorder %s1112_s30, %s1292_s0 }
  0x17   : > { %p879_p12 = pnand %p878_p11, %p877_p10  ;;  %p883_p1 = scmp.lt.u32.totalorder %s881_s12, %s876_s9 }
  0x18   : > { %p885_p3 = scmp.lt.u32.totalorder %s876_s9, %s1112_s30 }
  0x19   : > { %p880_p13 = pneg %p879_p12  ;;  %p884_p2 = por %p883_p1, %p882_p0 }
  0x1b   : > { %p886_p4 = por %p885_p3, %p884_p2 }
  0x1d   : > { %p887_p5 = pnand %p886_p4, %p880_p13 }
  0x1f   : > { %890 = shalt.err (!%p887_p5)
}
  0x20   : > { %s891_s22 = scalar_lea.vmem %s1120_s5, 256  ;;  %s1022_s27 = smov [#allocation3]  }
  0x21   : > { %p892_p6 = scmp.ne.s32.totalorder %s1120_s5, %s891_s22  ;;  %s896_s28 = sshll.u32 %s1022_s27, 4  ;;  %s897_s28 = int_to_ptr.vmem [resolvable:$false] %s896_s28 }
  0x22   : > { %s898_s29 = scalar_lea.vmem %s897_s28, 512  ;;  %p899_p12 = scmp.lt.s32.totalorder %s1120_s5, %s897_s28 }
  0x23   : > { %p894_p8 = pnand %p892_p6, %p878_p11  ;;  %p900_p0 = scmp.lt.s32.totalorder %s898_s29, %s891_s22 }
  0x25   : > { %p895_p10 = pneg %p894_p8  ;;  %p901_p1 = por %p900_p0, %p899_p12 }
  0x27   : > { %p902_p2 = pnand %p901_p1, %p895_p10 }
  0x29   : > { %905 = shalt.err (!%p902_p2)
}
  0x2a   : > { %764 = dma.hbm_to_vmem [thread:$0]  (!%p1116_p9), %s1112_s30, 256, %s1120_s5, %s174_s8  }
  0x2b   : > { %s1154_s10 = scalar_lea.hbm %s1293_s1, %s751_s26  ;;  %p705_p13 = scmp.ge.s32.totalorder %s1020_s17, 1 }
  0x2c   : > { %p216_p3 = scmp.lt.s32.totalorder %s1020_s17, 3  ;;  %s198_s11 = scalar_lea.vmem [#allocation6], %s702_s7 }
  0x2d   : > { %s208_s12 = sshll.u32 %s198_s11, 4  ;;  %s195_s30 = scalar_lea.sflag [#allocation7], %s1103_s25  ;;  %s1164_s12 = int_to_ptr.vmem [resolvable:$true] %s208_s12 }
  0x2e   : > { %p1160_p4 = pnand %p705_p13, %p216_p3  ;;  %s906_s5 = scalar_lea.hbm %s1154_s10, 4096 }
  0x2f   : > { %p907_p5 = scmp.ne.s32.totalorder %s1154_s10, %s906_s5  ;;  %s911_s21 = scalar_lea.hbm %s1293_s1, 8192 }
  0x30   : > { %p912_p10 = scmp.lt.u32.totalorder %s1154_s10, %s1293_s1  ;;  %p913_p12 = scmp.lt.u32.totalorder %s911_s21, %s906_s5 }
  0x31   : > { %p909_p6 = pnand %p907_p5, %p878_p11  ;;  %p915_p1 = scmp.lt.u32.totalorder %s906_s5, %s1154_s10 }
  0x32   : > { %p914_p0 = por %p913_p12, %p912_p10 }
  0x33   : > { %p910_p8 = pneg %p909_p6 }
  0x34   : > { %p916_p2 = por %p915_p1, %p914_p0 }
  0x36   : > { %p917_p13 = pnand %p916_p2, %p910_p8 }
  0x38   : > { %920 = shalt.err (!%p917_p13)
}
  0x39   : > { %s921_s27 = scalar_lea.vmem %s1164_s12, 4096  ;;  %s1023_s28 = smov [#allocation6]  }
  0x3a   : > { %p922_p3 = scmp.ne.s32.totalorder %s1164_s12, %s921_s27  ;;  %s926_s29 = sshll.u32 %s1023_s28, 4  ;;  %s927_s29 = int_to_ptr.vmem [resolvable:$false] %s926_s29 }
  0x3b   : > { %s928_s4 = scalar_lea.vmem %s927_s29, 8192  ;;  %p929_p7 = scmp.lt.s32.totalorder %s1164_s12, %s927_s29 }
  0x3c   : > { %p924_p5 = pnand %p922_p3, %p878_p11  ;;  %p930_p10 = scmp.lt.s32.totalorder %s928_s4, %s921_s27 }
  0x3e   : > { %p925_p6 = pneg %p924_p5  ;;  %p931_p12 = por %p930_p10, %p929_p7 }
  0x40   : > { %p932_p0 = pnand %p931_p12, %p925_p6 }
  0x42   : > { %935 = shalt.err (!%p932_p0)
}
  0x43   : > { %s1024_s9 = smov 512   ;;  %s1025_s11 = smov 256  }
  0x44   : > { %s1026_s5 = smov 16   ;;  %220 = sbr.rel (%p1160_p4) target bundleno = 407 (0x197), region = 32 }
  0x45   : > { %767 = dma.hbm_to_vmem [thread:$0]  (!%p1116_p9), %s1154_s10, 4096, %s1164_s12, %s195_s30, %s1024_s9, %s1025_s11, %s1026_s5  }
  0x46   : > { %s222_s26 = sand.u32 (!%p1160_p4), 1, %s1004_s13   ;;  %p1301_p7 = scmp.ne.s32.totalorder (!%p1160_p4), %s1298_s23, 0 }
  0x47   : > { %s706_s8 = sshll.u32 (!%p1160_p4), %s222_s26, 4  ;;  %s223_s21 = scalar_lea.sflag (!%p1160_p4), [#allocation4], %s222_s26 }
  0x48   : > { %s1195_s22 = scalar_lea.vmem (!%p1160_p4), [#allocation3], %s706_s8 }
  0x4b   : > { %987 = dma.done.wait (%p1301_p7), %s223_s21, 256  }
  0x4c   : > { %989 = vsyncadd (%p1301_p7), %s223_s21, 4294967040  ;;  %s707_s7 = sshll.u32 %s222_s26, 8  ;;  %s232_s6 = scalar_lea.sflag [#allocation7], %s222_s26 }
  0x4d   : > { %s1201_s25 = scalar_lea.vmem [#allocation6], %s707_s7 }
  0x4e   : > { %991 = dma.done.wait (%p1301_p7), %s232_s6, 4096  }
  0x4f   : > { %993 = vsyncadd (%p1301_p7), %s232_s6, 4294963200  ;;  %p708_p9 = scmp.ne.s32.totalorder %s1012_s15, 0 }
  0x50   : > { %v1027_v0 = vmov (!%p708_p9), 0.0  }
  0x51   : > { %271 = sbr.rel (%p708_p9) target bundleno = 88 (0x58), region = 44  ;;  %272 = vst [vmem:[#allocation2] sm:$0xff] (!%p708_p9), %v1027_v0 }
  0x58 PF: > { %v824_v1 = vld [vmem:[%s1201_s25 + $0x4] ss:$16 sps:$4 sm:$0xff]   ;;  %v826_v2 = vld [vmem:[%s1201_s25 + $0xc] ss:$16 sps:$4 sm:$0xff]   ;;  %v828_v3 = vld [vmem:[%s1201_s25] ss:$16 sps:$4 sm:$0xff]  }
  0x59   : > { %482 = vmatprep.subr.bf16.mxu0 %v824_v1  ;;  %v829_v4 = vld [vmem:[%s1201_s25 + $0x8] ss:$16 sps:$4 sm:$0xff]   ;;  %522 = vmatprep.subr.bf16.mxu1 %v826_v2  ;;  %v830_v5 = vld [vmem:[%s1201_s25 + $0x24] ss:$16 sps:$4 sm:$0xff]   ;;  %v832_v6 = vld [vmem:[%s1201_s25 + $0x2c] ss:$16 sps:$4 sm:$0xff]  }
  0x5a   : > { %483 = vmatpush1.bf16.xpose.msra.mxu0 %v828_v3  ;;  %523 = vmatpush1.bf16.xpose.msra.mxu1 %v829_v4  ;;  %v834_v7 = vld [vmem:[%s1201_s25 + $0x20] ss:$16 sps:$4 sm:$0xff]   ;;  %v835_v8 = vld [vmem:[%s1201_s25 + $0x28] ss:$16 sps:$4 sm:$0xff]   ;;  %v836_v9 = vld [vmem:[%s1201_s25 + $0x44] ss:$16 sps:$4 sm:$0xff]  }
  0x5b   : > { %484 = vmatprep.subr.bf16.mxu0 %v830_v5  ;;  %524 = vmatprep.subr.bf16.mxu1 %v832_v6  ;;  %v838_v10 = vld [vmem:[%s1201_s25 + $0x4c] ss:$16 sps:$4 sm:$0xff]   ;;  %v840_v11 = vld [vmem:[%s1201_s25 + $0x40] ss:$16 sps:$4 sm:$0xff]   ;;  %v841_v12 = vld [vmem:[%s1201_s25 + $0x48] ss:$16 sps:$4 sm:$0xff]  }
  0x5c   : > { %v842_v13 = vld [vmem:[%s1201_s25 + $0x64] ss:$16 sps:$4 sm:$0xff]   ;;  %v844_v14 = vld [vmem:[%s1201_s25 + $0x6c] ss:$16 sps:$4 sm:$0xff]   ;;  %v846_v19 = vld [vmem:[%s1201_s25 + $0x60] ss:$16 sps:$4 sm:$0xff]  }
  0x5d   : > { %v274_v15 = vld [vmem:[%s1195_s22] sm:$0xff]  ;;  %v275_v16 = vld [vmem:[%s1195_s22 + $0x8] sm:$0xff]  ;;  %p745_p11 = scmp.ne.s32.totalorder %s1012_s15, 1 }
  0x5e   : > { %v710_v17 = vcombine.high %v274_v15, %v274_v15  ;;  %v712_v18 = vcombine.high %v275_v16, %v275_v16  ;;  %v847_v20 = vld [vmem:[%s1201_s25 + $0x68] ss:$16 sps:$4 sm:$0xff]   ;;  %v848_v21 = vld [vmem:[%s1201_s25 + $0x84] ss:$16 sps:$4 sm:$0xff]   ;;  %v850_v22 = vld [vmem:[%s1201_s25 + $0x8c] ss:$16 sps:$4 sm:$0xff]   ;;  %v709_v37 = vcombine.low %v274_v15, %v274_v15  ;;  %v711_v38 = vcombine.low %v275_v16, %v275_v16 }
  0x5f   : > { %v852_v23 = vld [vmem:[%s1201_s25 + $0x80] ss:$16 sps:$4 sm:$0xff]   ;;  %v853_v24 = vld [vmem:[%s1201_s25 + $0x88] ss:$16 sps:$4 sm:$0xff]   ;;  %v854_v25 = vld [vmem:[%s1201_s25 + $0xa4] ss:$16 sps:$4 sm:$0xff]  }
  0x60   : > { %514 = vmatprep.mubr.bf16.mxu0 %v710_v17  ;;  %554 = vmatprep.mubr.bf16.mxu1 %v712_v18  ;;  %v856_v26 = vld [vmem:[%s1201_s25 + $0xac] ss:$16 sps:$4 sm:$0xff]   ;;  %v858_v27 = vld [vmem:[%s1201_s25 + $0xa0] ss:$16 sps:$4 sm:$0xff]   ;;  %v859_v28 = vld [vmem:[%s1201_s25 + $0xa8] ss:$16 sps:$4 sm:$0xff]  }
  0x61   : > { %v860_v29 = vld [vmem:[%s1201_s25 + $0xc4] ss:$16 sps:$4 sm:$0xff]   ;;  %v862_v30 = vld [vmem:[%s1201_s25 + $0xcc] ss:$16 sps:$4 sm:$0xff]   ;;  %v864_v31 = vld [vmem:[%s1201_s25 + $0xc0] ss:$16 sps:$4 sm:$0xff]  }
  0x62   : > { %485 = vmatpush1.bf16.xpose.msra.mxu0 %v834_v7  ;;  %525 = vmatpush1.bf16.xpose.msra.mxu1 %v835_v8  ;;  %v865_v32 = vld [vmem:[%s1201_s25 + $0xc8] ss:$16 sps:$4 sm:$0xff]   ;;  %v866_v33 = vld [vmem:[%s1201_s25 + $0xe4] ss:$16 sps:$4 sm:$0xff]   ;;  %v868_v34 = vld [vmem:[%s1201_s25 + $0xec] ss:$16 sps:$4 sm:$0xff]  }
  0x63   : > { %486 = vmatprep.subr.bf16.mxu0 %v836_v9  ;;  %526 = vmatprep.subr.bf16.mxu1 %v838_v10  ;;  %v870_v35 = vld [vmem:[%s1201_s25 + $0xe0] ss:$16 sps:$4 sm:$0xff]   ;;  %v871_v36 = vld [vmem:[%s1201_s25 + $0xe8] ss:$16 sps:$4 sm:$0xff]  }
  0x64   : > { %v273_v40 = vld [vmem:[#allocation2] sm:$0xff] }
  0x65   : > { %v746_v51 = vld [vmem:[%s1294_s2] ss:$0 sm:$0xff] (!%p745_p11) }
  0x6a   : > { %487 = vmatpush1.bf16.xpose.msra.mxu0 %v840_v11  ;;  %527 = vmatpush1.bf16.xpose.msra.mxu1 %v841_v12 }
  0x6b   : > { %488 = vmatprep.subr.bf16.mxu0 %v842_v13  ;;  %528 = vmatprep.subr.bf16.mxu1 %v844_v14 }
  0x72   : > { %489 = vmatpush1.bf16.xpose.msra.mxu0 %v846_v19  ;;  %529 = vmatpush1.bf16.xpose.msra.mxu1 %v847_v20 }
  0x73   : > { %490 = vmatprep.subr.bf16.mxu0 %v848_v21  ;;  %530 = vmatprep.subr.bf16.mxu1 %v850_v22 }
  0x7a   : > { %491 = vmatpush1.bf16.xpose.msra.mxu0 %v852_v23  ;;  %531 = vmatpush1.bf16.xpose.msra.mxu1 %v853_v24 }
  0x7b   : > { %492 = vmatprep.subr.bf16.mxu0 %v854_v25  ;;  %532 = vmatprep.subr.bf16.mxu1 %v856_v26 }
  0x82   : > { %493 = vmatpush1.bf16.xpose.msra.mxu0 %v858_v27  ;;  %533 = vmatpush1.bf16.xpose.msra.mxu1 %v859_v28 }
  0x83   : > { %494 = vmatprep.subr.bf16.mxu0 %v860_v29  ;;  %534 = vmatprep.subr.bf16.mxu1 %v862_v30 }
  0x8a   : > { %495 = vmatpush1.bf16.xpose.msra.mxu0 %v864_v31  ;;  %535 = vmatpush1.bf16.xpose.msra.mxu1 %v865_v32 }
  0x8b   : > { %496 = vmatprep.subr.bf16.mxu0 %v866_v33  ;;  %536 = vmatprep.subr.bf16.mxu1 %v868_v34 }
  0x92   : > { %497 = vmatpush1.bf16.xpose.msra.mxu0 %v870_v35  ;;  %537 = vmatpush1.bf16.xpose.msra.mxu1 %v871_v36 }
  0x99   : > { %515 = vmatmul.mubr.bf16.vlgmr.msra.gmra.mrb[0].mxu0 %v709_v37  ;;  %555 = vmatmul.mubr.bf16.vlgmr.msra.gmra.mrb[0].mxu1 %v711_v38 }
 0x16b   : > { %567 = sbr.rel (%p745_p11) target bundleno = 382 (0x17e), region = 48 }
 0x16c   : > { %v516_v39 = vpop.f32.mrb[0].mxu0  ;;  %v556_v41 = vpop.f32.mrb[0].mxu1 }
 0x16d   : > { %v557_v42 = vadd.f32 %v556_v41, %v516_v39  ;;  %v518_v43 = vpop.f32.mrb[1].mxu0  ;;  %v558_v44 = vpop.f32.mrb[1].mxu1 }
 0x16e   : > { %v519_v45 = vpop.f32.mrb[2].mxu0  ;;  %v559_v46 = vpop.f32.mrb[2].mxu1 }
 0x16f   : > { %v562_v47 = vadd.f32 %v557_v42, %v273_v40  ;;  %v520_v48 = vpop.f32.mrb[3].mxu0  ;;  %v560_v49 = vpop.f32.mrb[3].mxu1 }
 0x171   : > { %563 = vst [vmem:[#allocation2] sm:$0xff] %v562_v47 }
 0x178   : > { %v568_v50 = vld [vmem:[#allocation2] sm:$0xff] }
 0x179   : > { %v576_v52 = vadd.f32 %v746_v51, %v568_v50 }
 0x17b   : > { %v577_v53 = vmax.f32 %v576_v52, 0.0 }
 0x17d   : > { %578 = vst [vmem:[#allocation8] sm:$0xff] %v577_v53 }
 0x17e PF: > { %p1248_p4 = scmp.eq.s32.totalorder %s695_s18, 1  ;;  %s1028_s20 = smov [#allocation8]  }
 0x17f   : > { %s589_s30 = sshll.u32 %s1028_s20, 4  ;;  %s590_s30 = int_to_ptr.vmem [resolvable:$true] %s589_s30 }
 0x180   : > { %s936_s15 = scalar_lea.vmem %s590_s30, 128  ;;  %p943_p13 = scmp.lt.s32.totalorder %s590_s30, %s590_s30 }
 0x181   : > { %p937_p8 = scmp.ne.s32.totalorder %s590_s30, %s936_s15  ;;  %p944_p3 = scmp.lt.s32.totalorder %s936_s15, %s936_s15 }
 0x183   : > { %p938_p1 = pnand %p937_p8, %p1248_p4  ;;  %p945_p5 = por %p944_p3, %p943_p13 }
 0x185   : > { %p939_p2 = pneg %p938_p1 }
 0x187   : > { %p946_p6 = pnand %p945_p5, %p939_p2 }
 0x189   : > { %949 = shalt.err (!%p946_p6)
}
 0x18a   : > { %s950_s18 = scalar_lea.hbm %s1295_s3, 128 }
 0x18b   : > { %p951_p10 = scmp.ne.s32.totalorder %s1295_s3, %s950_s18  ;;  %p956_p7 = scmp.lt.u32.totalorder %s950_s18, %s1295_s3 }
 0x18d   : > { %p952_p12 = pnand %p951_p10, %p1248_p4 }
 0x18f   : > { %p953_p0 = pneg %p952_p12 }
 0x191   : > { %p958_p9 = pnand %p956_p7, %p953_p0 }
 0x193   : > { %961 = shalt.err (!%p958_p9)
}
 0x194   : > { %758 = dma.vmem_to_hbm [thread:$0]  (%p1248_p4), %s590_s30, 128, %s1295_s3, [#allocation5]  }
 0x195   : > { %995 = dma.done.wait (%p1248_p4), [#allocation5], 128  }
 0x196   : > { %997 = vsyncadd (%p1248_p4), [#allocation5], 4294967168 }
 0x197 PF: > { %s20_s17 = sadd.s32 1, %s1020_s17   ;;  %s1303_s12 = smov %s1004_s13 }
 0x198   : > { %p17_p11 = scmp.ge.s32.totalorder %s20_s17, 4   ;;  %s1304_s13 = smov %s1008_s14 }
 0x199   : > { %s1305_s14 = smov %s1100_s24  ;;  %s1306_s15 = smov %s1016_s16 }
 0x19a   : > { %s1307_s16 = smov %s1309_s19  ;;  %19 = sbr.rel (!%p17_p11) target bundleno = 7 (0x7), region = 94 }
 0x1a1   :  { %602 = vsyncpa [#allocation4], 1 }
 0x1a2   :  { %604 = vsyncpa [#allocation4 + $0x1], 1 }
 0x1a3   :  { %605 = vsyncpa [#allocation7], 1 }
 0x1a4   :  { %607 = vsyncpa [#allocation7 + $0x1], 1 }
 0x1a5   :  { %608 = vsyncpa [#allocation5], 1 }
 0x1a6   :  { %610 = vsyncpa [#allocation5 + $0x1], 1 }

</bundles_post_ra>
